<compile_context>
chip_gen: v7x
topology: tpu7x:2x2x1
jax: 0.10.0
libtpu: 0.0.40
codegen_flags: <defaults>
</compile_context>

<pallas_src>
import functools

import jax
import jax.numpy as jnp
from jax import lax
from jax.experimental import pallas as pl
from jax.experimental.pallas import tpu as pltpu

NEG = -1e30    # finite stand-in for -inf (avoids inf - inf -> NaN inside the DP)
LANES = 128    # lane-dense output width


def _ctc_kernel(tmax_ref,                                            # scalar prefetch (SMEM): (G,) group max T
                x_ref, w_ref, b_ref, onehot_ref, skip_ref, valid_ref, final_ref, tlen_ref,
                out_ref, emit_scratch, alpha_ref):
    g = pl.program_id(0)
    BT, D = x_ref.shape                       # BT = B_TILE * T
    B_TILE, C, S = onehot_ref.shape
    T = BT // B_TILE

    # ---- 1) classifier (MXU, bf16 in / f32 accumulate) + bias --------------------------------
    logits = jnp.dot(x_ref[...], w_ref[...],
                     preferred_element_type=jnp.float32) + b_ref[...]          # (B_TILE*T, C) f32

    # ---- 2) fused log_softmax normalizer + one-hot gather of extended-label emissions --------
    # emit[i,t,s] = log_softmax(logits)[i,t, ext[i,s]] = (logits @ onehot)[i,t,s] - logZ[i,t]
    m = jnp.max(logits, axis=-1, keepdims=True)
    logz = m + jnp.log(jnp.sum(jnp.exp(logits - m), axis=-1, keepdims=True))   # (B_TILE*T, 1)
    raw = lax.dot_general(logits.reshape(B_TILE, T, C), onehot_ref[...],
                          dimension_numbers=(((2,), (1,)), ((0,), (0,))),
                          preferred_element_type=jnp.float32)                  # (B_TILE, T, S)
    # scratch row layout: row (i*T + t) holds sample i, time t
    emit_scratch[...] = raw.reshape(BT, S) - logz

    def read_emit(t):
        # rows t, t+T, ..., t+(B_TILE-1)*T  ->  one (B_TILE, S) slab for time step t
        return emit_scratch[pl.ds(t, B_TILE, stride=T), :]

    # ---- 3) CTC forward (alpha) recursion, vectorized over B_TILE samples on the sublane axis -
    # hoisted loop invariants
    s_idx = lax.broadcasted_iota(jnp.int32, (1, S), 1)
    mask1 = s_idx >= 1                        # (1, S)       s-1 transition exists
    mask2 = skip_ref[...] > 0.5               # (B_TILE, S)  s-2 "skip" transition (incl. s>=2)
    valid_m = valid_ref[...] > 0.5            # (B_TILE, S)  s < 2*label_len + 1
    final_m = final_ref[...] > 0.5            # (B_TILE, S)  s in {2L-1, 2L}
    tlen = tlen_ref[...]                      # (B_TILE, 1)  per-sample clamp(feature_size, T)

    alpha_ref[...] = jnp.where((s_idx <= 1) & valid_m, read_emit(0), NEG)

    @pl.loop(1, tmax_ref[g])                  # dynamic trip count: group max feature length
    def _(t):
        alpha = alpha_ref[...]
        a1 = jnp.where(mask1, pltpu.roll(alpha, shift=1, axis=1), NEG)
        a2 = jnp.where(mask2, pltpu.roll(alpha, shift=2, axis=1), NEG)
        mx = jnp.maximum(alpha, jnp.maximum(a1, a2))
        lse = mx + jnp.log(jnp.exp(alpha - mx) + jnp.exp(a1 - mx) + jnp.exp(a2 - mx))
        new = jnp.where(valid_m, read_emit(t) + lse, NEG)
        # samples whose feature_size has already been reached keep their alpha frozen
        alpha_ref[...] = jnp.where(t < tlen, new, alpha)

    # ---- 4) per-sample log-likelihood over the last two extended states ----------------------
    alpha = alpha_ref[...]
    fin = jnp.where(final_m, alpha, NEG)
    mxf = jnp.max(fin, axis=-1, keepdims=True)
    ll = mxf + jnp.log(jnp.sum(jnp.exp(fin - mxf), axis=-1, keepdims=True))    # (B_TILE, 1)
    out_ref[...] = jnp.broadcast_to(-ll, out_ref.shape)


def ctc_letter_criterion(features, feature_size, label, label_size, w, bias, n_letters,
                         b_tile=8):
    """Returns the (1, 1) loss matching CTCLetterCriterion.forward."""
    B, T, D = features.shape
    C = n_letters + 1
    blank = n_letters
    L_max = label.shape[1]
    S = 2 * L_max + 1

    G = -(-B // b_tile)            # ceil(B / b_tile) batch groups, one per grid step
    B_pad = G * b_tile
    pad = B_pad - B

    feature_size = feature_size.astype(jnp.int32)
    label_size = label_size.astype(jnp.int32)
    label_i = label.astype(jnp.int32)

    if pad:
        features_p = jnp.pad(features, ((0, pad), (0, 0), (0, 0)))
        label_p = jnp.pad(label_i, ((0, pad), (0, 0)))
        feat_sz_p = jnp.pad(feature_size, (0, pad), constant_values=1)
        lab_sz_p = jnp.pad(label_size, (0, pad), constant_values=1)
    else:
        features_p, label_p, feat_sz_p, lab_sz_p = features, label_i, feature_size, label_size

    # Glue: blank-interleaved extended-label bookkeeping (cheap integer work, stays in XLA).
    s_idx = jnp.arange(S)
    lab_pos = jnp.clip((s_idx - 1) // 2, 0, L_max - 1)
    ext = jnp.where((s_idx % 2 == 1)[None, :], jnp.take(label_p, lab_pos, axis=1), blank)  # (B_pad, S)
    onehot = (jnp.arange(C)[None, :, None] == ext[:, None, :]).astype(jnp.float32)         # (B_pad, C, S)
    ext_m2 = jnp.roll(ext, 2, axis=1)
    skip = (((s_idx % 2 == 1) & (s_idx >= 2))[None, :]
            & (ext != ext_m2)).astype(jnp.float32)                                          # (B_pad, S)
    valid = (s_idx[None, :] < (2 * lab_sz_p[:, None] + 1)).astype(jnp.float32)              # (B_pad, S)
    final = ((s_idx[None, :] == 2 * lab_sz_p[:, None])
             | (s_idx[None, :] == 2 * lab_sz_p[:, None] - 1)).astype(jnp.float32)           # (B_pad, S)

    tlen = jnp.minimum(feat_sz_p, T).reshape(B_pad, 1)                                      # (B_pad, 1)
    group_tmax = jnp.max(tlen.reshape(G, b_tile), axis=1).astype(jnp.int32)                 # (G,)

    feats2d = features_p.astype(jnp.bfloat16).reshape(B_pad * T, D)   # bf16: halves feature DMA
    w_bf = w.astype(jnp.bfloat16)
    bias2d = bias.reshape(1, C).astype(jnp.float32)

    out = pl.pallas_call(
        _ctc_kernel,
        out_shape=jax.ShapeDtypeStruct((B_pad, LANES), jnp.float32),
        grid_spec=pltpu.PrefetchScalarGridSpec(
            num_scalar_prefetch=1,                                    # group_tmax -> SMEM
            grid=(G,),
            in_specs=[
                pl.BlockSpec((b_tile * T, D), lambda g, tm: (g, 0)),     # features (bf16)
                pl.BlockSpec((D, C),          lambda g, tm: (0, 0)),     # classifier weight (bf16)
                pl.BlockSpec((1, C),          lambda g, tm: (0, 0)),     # classifier bias (f32)
                pl.BlockSpec((b_tile, C, S),  lambda g, tm: (g, 0, 0)),  # extended-label one-hot
                pl.BlockSpec((b_tile, S),     lambda g, tm: (g, 0)),     # skip-transition mask
                pl.BlockSpec((b_tile, S),     lambda g, tm: (g, 0)),     # valid-state mask
                pl.BlockSpec((b_tile, S),     lambda g, tm: (g, 0)),     # final-state mask
                pl.BlockSpec((b_tile, 1),     lambda g, tm: (g, 0)),     # per-sample length (int32)
            ],
            out_specs=pl.BlockSpec((b_tile, LANES), lambda g, tm: (g, 0)),
            scratch_shapes=[
                pltpu.VMEM((b_tile * T, S), jnp.float32),   # emission log-probs, row = i*T + t
                pltpu.VMEM((b_tile, S), jnp.float32),       # alpha (DP state), one group per step
            ],
        ),
        compiler_params=pltpu.CompilerParams(dimension_semantics=("parallel",)),
    )(group_tmax, feats2d, w_bf, bias2d, onehot, skip, valid, final, tlen)

    per_sample = out[:B, 0]                                           # -log p(label | input)
    per_sample = jnp.where(per_sample > 1e29, 0.0, per_sample)        # zero_infinity=True
    per_sample = per_sample / label_size.astype(jnp.float32)          # 'mean': divide by target len
    # nn.CTCLoss(reduction='mean') then .view(1, -1)  ->  shape (1, 1)
    return jnp.mean(per_sample).reshape(1, -1)


if __name__ == "__main__":
    key = jax.random.PRNGKey(0)
    B, T, D = 2, 16, 32
    n_letters = 12            # blank index = 12, num classes = 13
    L_max = 6

    k1, k2, k3, k4 = jax.random.split(key, 4)
    features = jax.random.normal(k1, (B, T, D), jnp.float32)
    w = 0.1 * jax.random.normal(k2, (D, n_letters + 1), jnp.float32)
    bias = 0.1 * jax.random.normal(k3, (n_letters + 1,), jnp.float32)
    label = jax.random.randint(k4, (B, L_max), 0, n_letters, jnp.int32)   # never the blank
    feature_size = jnp.array([16, 11], jnp.int32)
    label_size = jnp.array([6, 3], jnp.int32)
    assert int(label_size.min()) > 0          # mirrors the PyTorch assert

    fn = jax.jit(functools.partial(ctc_letter_criterion, n_letters=n_letters))
    loss = jax.block_until_ready(fn(features, feature_size, label, label_size, w, bias))

    assert loss.shape == (1, 1)
    # mirrors: assert not (torch.isinf(loss).any() or torch.isnan(loss).any())
    assert bool(jnp.isfinite(loss).all())
    print("KERNEL_OK")
</pallas_src>

<mosaic_0001>
module attributes {stable_mosaic.version = 11 : i64} {
  func.func @_ctc_kernel(%arg0: i32, %arg1: memref<1xi32, #tpu.memory_space<smem>>, %arg2: memref<128x32xbf16, #tpu.memory_space<vmem>>, %arg3: memref<32x13xbf16, #tpu.memory_space<vmem>>, %arg4: memref<1x13xf32, #tpu.memory_space<vmem>>, %arg5: memref<8x13x13xf32, #tpu.memory_space<vmem>>, %arg6: memref<8x13xf32, #tpu.memory_space<vmem>>, %arg7: memref<8x13xf32, #tpu.memory_space<vmem>>, %arg8: memref<8x13xf32, #tpu.memory_space<vmem>>, %arg9: memref<8x1xi32, #tpu.memory_space<vmem>>, %arg10: memref<8x128xf32, #tpu.memory_space<vmem>>, %arg11: memref<128x13xf32, #tpu.memory_space<vmem>>, %arg12: memref<8x13xf32, #tpu.memory_space<vmem>>) attributes {dimension_semantics = [#tpu.dimension_semantics<parallel>], iteration_bounds = array<i64: 1>, scalar_prefetch = 1 : i64, scratch_operands = 2 : i64, tpu.core_type = #tpu.core_type<tc>, window_params = [{transform_indices = @transform_0, window_bounds = array<i64: 128, 32>}, {pipeline_mode = #tpu.pipeline_mode<synchronous>, transform_indices = @transform_1, window_bounds = array<i64: 32, 13>}, {pipeline_mode = #tpu.pipeline_mode<synchronous>, transform_indices = @transform_2, window_bounds = array<i64: 1, 13>}, {transform_indices = @transform_3, window_bounds = array<i64: 8, 13, 13>}, {transform_indices = @transform_4, window_bounds = array<i64: 8, 13>}, {transform_indices = @transform_5, window_bounds = array<i64: 8, 13>}, {transform_indices = @transform_6, window_bounds = array<i64: 8, 13>}, {transform_indices = @transform_7, window_bounds = array<i64: 8, 1>}, {transform_indices = @transform_8, window_bounds = array<i64: 8, 128>}]} {
    %c0 = arith.constant 0 : index
    %c0_0 = arith.constant 0 : index
    %0 = vector.load %arg2[%c0, %c0_0] : memref<128x32xbf16, #tpu.memory_space<vmem>>, vector<128x32xbf16>
    %c0_1 = arith.constant 0 : index
    %c0_2 = arith.constant 0 : index
    %1 = vector.load %arg3[%c0_1, %c0_2] : memref<32x13xbf16, #tpu.memory_space<vmem>>, vector<32x13xbf16>
    %cst = arith.constant dense<0.000000e+00> : vector<128x13xf32>
    %2 = tpu.matmul %0, %1, %cst {dimension_numbers = #tpu.dot_dimension_numbers<[1], [0], [0], [1], [0, 0, 1, 1], [], []>} : vector<128x32xbf16>, vector<32x13xbf16>, vector<128x13xf32> -> vector<128x13xf32>
    %c0_3 = arith.constant 0 : index
    %c0_4 = arith.constant 0 : index
    %3 = vector.load %arg4[%c0_3, %c0_4] : memref<1x13xf32, #tpu.memory_space<vmem>>, vector<1x13xf32>
    %4 = vector.broadcast %3 : vector<1x13xf32> to vector<128x13xf32>
    %5 = arith.addf %2, %4 : vector<128x13xf32>
    %cst_5 = arith.constant dense<0xFF800000> : vector<128xf32>
    %6 = vector.multi_reduction <maximumf>, %5, %cst_5 [1] : vector<128x13xf32> to vector<128xf32>
    %7 = vector.shape_cast %6 : vector<128xf32> to vector<128x1xf32>
    %8 = vector.broadcast %7 : vector<128x1xf32> to vector<128x13xf32>
    %9 = arith.subf %5, %8 : vector<128x13xf32>
    %10 = math.exp %9 : vector<128x13xf32>
    %cst_6 = arith.constant dense<0.000000e+00> : vector<128xf32>
    %11 = vector.multi_reduction <add>, %10, %cst_6 [1] : vector<128x13xf32> to vector<128xf32>
    %12 = vector.shape_cast %11 : vector<128xf32> to vector<128x1xf32>
    %13 = math.log %12 : vector<128x1xf32>
    %14 = arith.addf %7, %13 : vector<128x1xf32>
    %15 = vector.shape_cast %5 : vector<128x13xf32> to vector<8x16x13xf32>
    %c0_7 = arith.constant 0 : index
    %c0_8 = arith.constant 0 : index
    %c0_9 = arith.constant 0 : index
    %16 = vector.load %arg5[%c0_7, %c0_8, %c0_9] : memref<8x13x13xf32, #tpu.memory_space<vmem>>, vector<8x13x13xf32>
    %cst_10 = arith.constant dense<0.000000e+00> : vector<8x16x13xf32>
    %17 = tpu.matmul %15, %16, %cst_10 {dimension_numbers = #tpu.dot_dimension_numbers<[2], [1], [1], [2], [0, 0, 0, 1, 1, 2], [0], [0]>} : vector<8x16x13xf32>, vector<8x13x13xf32>, vector<8x16x13xf32> -> vector<8x16x13xf32>
    %18 = vector.shape_cast %17 : vector<8x16x13xf32> to vector<128x13xf32>
    %19 = vector.broadcast %14 : vector<128x1xf32> to vector<128x13xf32>
    %20 = arith.subf %18, %19 : vector<128x13xf32>
    %c0_11 = arith.constant 0 : index
    %c0_12 = arith.constant 0 : index
    %21 = vector.load %arg11[%c0_11, %c0_12] : memref<128x13xf32, #tpu.memory_space<vmem>>, vector<128x13xf32>
    tpu.vector_store %arg11[%c0_11, %c0_12], %20 {strides = array<i32>} : memref<128x13xf32, #tpu.memory_space<vmem>>, vector<128x13xf32>,
    %22 = tpu.iota {dimensions = array<i32: 1>} : vector<1x13xi32>
    %c1_i32 = arith.constant 1 : i32
    %23 = vector.broadcast %c1_i32 : i32 to vector<1x13xi32>
    %24 = arith.cmpi sge, %22, %23 : vector<1x13xi32>
    %c0_13 = arith.constant 0 : index
    %c0_14 = arith.constant 0 : index
    %25 = vector.load %arg6[%c0_13, %c0_14] : memref<8x13xf32, #tpu.memory_space<vmem>>, vector<8x13xf32>
    %cst_15 = arith.constant 5.000000e-01 : f32
    %26 = vector.broadcast %cst_15 : f32 to vector<8x13xf32>
    %27 = arith.cmpf ogt, %25, %26 : vector<8x13xf32>
    %c0_16 = arith.constant 0 : index
    %c0_17 = arith.constant 0 : index
    %28 = vector.load %arg7[%c0_16, %c0_17] : memref<8x13xf32, #tpu.memory_space<vmem>>, vector<8x13xf32>
    %cst_18 = arith.constant 5.000000e-01 : f32
    %29 = vector.broadcast %cst_18 : f32 to vector<8x13xf32>
    %30 = arith.cmpf ogt, %28, %29 : vector<8x13xf32>
    %c0_19 = arith.constant 0 : index
    %c0_20 = arith.constant 0 : index
    %31 = vector.load %arg8[%c0_19, %c0_20] : memref<8x13xf32, #tpu.memory_space<vmem>>, vector<8x13xf32>
    %cst_21 = arith.constant 5.000000e-01 : f32
    %32 = vector.broadcast %cst_21 : f32 to vector<8x13xf32>
    %33 = arith.cmpf ogt, %31, %32 : vector<8x13xf32>
    %c0_22 = arith.constant 0 : index
    %c0_23 = arith.constant 0 : index
    %34 = vector.load %arg9[%c0_22, %c0_23] : memref<8x1xi32, #tpu.memory_space<vmem>>, vector<8x1xi32>
    %c1_i32_24 = arith.constant 1 : i32
    %35 = vector.broadcast %c1_i32_24 : i32 to vector<1x13xi32>
    %36 = arith.cmpi sle, %22, %35 : vector<1x13xi32>
    %37 = vector.broadcast %36 : vector<1x13xi1> to vector<8x13xi1>
    %38 = arith.andi %37, %30 : vector<8x13xi1>
    %c0_25 = arith.constant 0 : index
    %c0_26 = arith.constant 0 : index
    %39 = tpu.strided_load %arg11[%c0_25, %c0_26] {strides = array<i32: 16, 1>} : memref<128x13xf32, #tpu.memory_space<vmem>>, vector<8x13xf32>
    %cst_27 = arith.constant -1.000000e+30 : f32
    %40 = vector.broadcast %cst_27 : f32 to vector<8x13xf32>
    %41 = arith.select %38, %39, %40 : vector<8x13xi1>, vector<8x13xf32>
    %c0_28 = arith.constant 0 : index
    %c0_29 = arith.constant 0 : index
    %42 = vector.load %arg12[%c0_28, %c0_29] : memref<8x13xf32, #tpu.memory_space<vmem>>, vector<8x13xf32>
    tpu.vector_store %arg12[%c0_28, %c0_29], %41 {strides = array<i32>} : memref<8x13xf32, #tpu.memory_space<vmem>>, vector<8x13xf32>,
    %43 = arith.index_cast %arg0 : i32 to index
    %44 = memref.load %arg1[%43] : memref<1xi32, #tpu.memory_space<smem>>
    %c1_i32_30 = arith.constant 1 : i32
    %45 = arith.subi %44, %c1_i32_30 : i32
    %c1_i32_31 = arith.constant 1 : i32
    %c1_i32_32 = arith.constant 1 : i32
    %46 = arith.subi %c1_i32_31, %c1_i32_32 : i32
    %47 = arith.addi %45, %46 : i32
    %c1_i32_33 = arith.constant 1 : i32
    %48 = arith.divsi %47, %c1_i32_33 : i32
    %c1_i32_34 = arith.constant 1 : i32
    %c1_i32_35 = arith.constant 1 : i32
    %c0_i32 = arith.constant 0 : i32
    %49 = arith.subi %48, %c0_i32 : i32
    %50 = arith.addi %c0_i32, %49 : i32
    %c1_i32_36 = arith.constant 1 : i32
    scf.for %arg13 = %c0_i32 to %50 step %c1_i32_36  : i32 {
      %68 = arith.muli %arg13, %c1_i32_34 : i32
      %69 = arith.addi %c1_i32_35, %68 : i32
      %c0_45 = arith.constant 0 : index
      %c0_46 = arith.constant 0 : index
      %70 = vector.load %arg12[%c0_45, %c0_46] : memref<8x13xf32, #tpu.memory_space<vmem>>, vector<8x13xf32>
      %c1_i32_47 = arith.constant 1 : i32
      %71 = tpu.dynamic_rotate %70 by %c1_i32_47 dim 1 : vector<8x13xf32>, i32 -> vector<8x13xf32>
      %cst_48 = arith.constant -1.000000e+30 : f32
      %72 = vector.shape_cast %24 : vector<1x13xi1> to vector<1x13xi1>
      %73 = vector.broadcast %72 : vector<1x13xi1> to vector<8x13xi1>
      %74 = vector.broadcast %cst_48 : f32 to vector<8x13xf32>
      %75 = arith.select %73, %71, %74 : vector<8x13xi1>, vector<8x13xf32>
      %c2_i32 = arith.constant 2 : i32
      %76 = tpu.dynamic_rotate %70 by %c2_i32 dim 1 : vector<8x13xf32>, i32 -> vector<8x13xf32>
      %cst_49 = arith.constant -1.000000e+30 : f32
      %77 = vector.broadcast %cst_49 : f32 to vector<8x13xf32>
      %78 = arith.select %27, %76, %77 : vector<8x13xi1>, vector<8x13xf32>
      %79 = arith.maximumf %75, %78 : vector<8x13xf32>
      %80 = arith.maximumf %70, %79 : vector<8x13xf32>
      %81 = arith.subf %70, %80 : vector<8x13xf32>
      %82 = math.exp %81 : vector<8x13xf32>
      %83 = arith.subf %75, %80 : vector<8x13xf32>
      %84 = math.exp %83 : vector<8x13xf32>
      %85 = arith.addf %82, %84 : vector<8x13xf32>
      %86 = arith.subf %78, %80 : vector<8x13xf32>
      %87 = math.exp %86 : vector<8x13xf32>
      %88 = arith.addf %85, %87 : vector<8x13xf32>
      %89 = math.log %88 : vector<8x13xf32>
      %90 = arith.addf %80, %89 : vector<8x13xf32>
      %91 = arith.index_cast %69 : i32 to index
      %c0_50 = arith.constant 0 : index
      %92 = tpu.strided_load %arg11[%91, %c0_50] {strides = array<i32: 16, 1>} : memref<128x13xf32, #tpu.memory_space<vmem>>, vector<8x13xf32>
      %93 = arith.addf %92, %90 : vector<8x13xf32>
      %cst_51 = arith.constant -1.000000e+30 : f32
      %94 = vector.broadcast %cst_51 : f32 to vector<8x13xf32>
      %95 = arith.select %30, %93, %94 : vector<8x13xi1>, vector<8x13xf32>
      %96 = vector.broadcast %69 : i32 to vector<8x1xi32>
      %97 = arith.cmpi slt, %96, %34 : vector<8x1xi32>
      %98 = vector.shape_cast %97 : vector<8x1xi1> to vector<8x1xi1>
      %99 = vector.broadcast %98 : vector<8x1xi1> to vector<8x13xi1>
      %100 = arith.select %99, %95, %70 : vector<8x13xi1>, vector<8x13xf32>
      %c0_52 = arith.constant 0 : index
      %c0_53 = arith.constant 0 : index
      %101 = vector.load %arg12[%c0_52, %c0_53] : memref<8x13xf32, #tpu.memory_space<vmem>>, vector<8x13xf32>
      tpu.vector_store %arg12[%c0_52, %c0_53], %100 {strides = array<i32>} : memref<8x13xf32, #tpu.memory_space<vmem>>, vector<8x13xf32>,
    }
    %c0_37 = arith.constant 0 : index
    %c0_38 = arith.constant 0 : index
    %51 = vector.load %arg12[%c0_37, %c0_38] : memref<8x13xf32, #tpu.memory_space<vmem>>, vector<8x13xf32>
    %cst_39 = arith.constant -1.000000e+30 : f32
    %52 = vector.broadcast %cst_39 : f32 to vector<8x13xf32>
    %53 = arith.select %33, %51, %52 : vector<8x13xi1>, vector<8x13xf32>
    %cst_40 = arith.constant dense<0xFF800000> : vector<8xf32>
    %54 = vector.multi_reduction <maximumf>, %53, %cst_40 [1] : vector<8x13xf32> to vector<8xf32>
    %55 = vector.shape_cast %54 : vector<8xf32> to vector<8x1xf32>
    %56 = vector.broadcast %55 : vector<8x1xf32> to vector<8x13xf32>
    %57 = arith.subf %53, %56 : vector<8x13xf32>
    %58 = math.exp %57 : vector<8x13xf32>
    %cst_41 = arith.constant dense<0.000000e+00> : vector<8xf32>
    %59 = vector.multi_reduction <add>, %58, %cst_41 [1] : vector<8x13xf32> to vector<8xf32>
    %60 = vector.shape_cast %59 : vector<8xf32> to vector<8x1xf32>
    %61 = math.log %60 : vector<8x1xf32>
    %62 = arith.addf %55, %61 : vector<8x1xf32>
    %cst_42 = arith.constant 0.000000e+00 : f32
    %63 = vector.broadcast %cst_42 : f32 to vector<8x1xf32>
    %64 = arith.subf %63, %62 : vector<8x1xf32>
    %65 = vector.shape_cast %64 : vector<8x1xf32> to vector<8x1xf32>
    %66 = vector.broadcast %65 : vector<8x1xf32> to vector<8x128xf32>
    %c0_43 = arith.constant 0 : index
    %c0_44 = arith.constant 0 : index
    %67 = vector.load %arg10[%c0_43, %c0_44] : memref<8x128xf32, #tpu.memory_space<vmem>>, vector<8x128xf32>
    tpu.vector_store %arg10[%c0_43, %c0_44], %66 {strides = array<i32>} : memref<8x128xf32, #tpu.memory_space<vmem>>, vector<8x128xf32>,
    return
  }
  func.func @transform_0(%arg0: i32, %arg1: memref<1xi32, #tpu.memory_space<smem>>) -> (i32, i32) {
    %c0_i32 = arith.constant 0 : i32
    %c0_i32_0 = arith.constant 0 : i32
    return %arg0, %c0_i32 : i32, i32
  }
  func.func @transform_1(%arg0: i32, %arg1: memref<1xi32, #tpu.memory_space<smem>>) -> (i32, i32) {
    %c0_i32 = arith.constant 0 : i32
    %c0_i32_0 = arith.constant 0 : i32
    %c0_i32_1 = arith.constant 0 : i32
    return %c0_i32, %c0_i32_0 : i32, i32
  }
  func.func @transform_2(%arg0: i32, %arg1: memref<1xi32, #tpu.memory_space<smem>>) -> (i32, i32) {
    %c0_i32 = arith.constant 0 : i32
    %c0_i32_0 = arith.constant 0 : i32
    %c0_i32_1 = arith.constant 0 : i32
    return %c0_i32, %c0_i32_0 : i32, i32
  }
  func.func @transform_3(%arg0: i32, %arg1: memref<1xi32, #tpu.memory_space<smem>>) -> (i32, i32, i32) {
    %c0_i32 = arith.constant 0 : i32
    %c0_i32_0 = arith.constant 0 : i32
    %c0_i32_1 = arith.constant 0 : i32
    return %arg0, %c0_i32, %c0_i32_0 : i32, i32, i32
  }
  func.func @transform_4(%arg0: i32, %arg1: memref<1xi32, #tpu.memory_space<smem>>) -> (i32, i32) {
    %c0_i32 = arith.constant 0 : i32
    %c0_i32_0 = arith.constant 0 : i32
    return %arg0, %c0_i32 : i32, i32
  }
  func.func @transform_5(%arg0: i32, %arg1: memref<1xi32, #tpu.memory_space<smem>>) -> (i32, i32) {
    %c0_i32 = arith.constant 0 : i32
    %c0_i32_0 = arith.constant 0 : i32
    return %arg0, %c0_i32 : i32, i32
  }
  func.func @transform_6(%arg0: i32, %arg1: memref<1xi32, #tpu.memory_space<smem>>) -> (i32, i32) {
    %c0_i32 = arith.constant 0 : i32
    %c0_i32_0 = arith.constant 0 : i32
    return %arg0, %c0_i32 : i32, i32
  }
  func.func @transform_7(%arg0: i32, %arg1: memref<1xi32, #tpu.memory_space<smem>>) -> (i32, i32) {
    %c0_i32 = arith.constant 0 : i32
    %c0_i32_0 = arith.constant 0 : i32
    return %arg0, %c0_i32 : i32, i32
  }
  func.func @transform_8(%arg0: i32, %arg1: memref<1xi32, #tpu.memory_space<smem>>) -> (i32, i32) {
    %c0_i32 = arith.constant 0 : i32
    %c0_i32_0 = arith.constant 0 : i32
    return %arg0, %c0_i32 : i32, i32
  }
}

</mosaic_0001>

<bundles_post_ra>
// kernel: ctc_letter_criterion.1
= control target key start
LH: loop header
LB: loop body
LE: loop exit
PB: predicated region body
PF: predicated region fallthrough
CT: control target
= control target key end

     0   :  { %vm111_vm0 = vcmask 261120   ;;  %vm448_vm1 = vcmask 1044480   ;;  %vm1583_vm2 = vmmov 1   ;;  %vm233_vm4 = vcmask 105472   ;;  %s2098_s2 = inlined_call_operand.vmem [shape: bf16[32,13], index: 2, kind: input, shape index: {}]   ;;  %s2099_s9 = inlined_call_operand.vmem [shape: f32[8,128], index: 9, kind: output, shape index: {}]   ;;  %s2100_s1 = inlined_call_operand.vmem [shape: bf16[128,32], index: 1, kind: input, shape index: {}]   ;;  %s2101_s4 = inlined_call_operand.vmem [shape: f32[8,13,13], index: 4, kind: input, shape index: {}]   ;;  %s2102_s3 = inlined_call_operand.vmem [shape: f32[1,13], index: 3, kind: input, shape index: {}]   ;;  %s2103_s0 = inlined_call_operand.<no memory space> [shape: s32[1], index: 0, kind: input, shape index: {}]   ;;  %s2104_s5 = inlined_call_operand.vmem [shape: f32[8,13], index: 5, kind: input, shape index: {}]   ;;  %s2105_s7 = inlined_call_operand.vmem [shape: f32[8,13], index: 7, kind: input, shape index: {}]   ;;  %s2106_s8 = inlined_call_operand.vmem [shape: s32[8,1], index: 8, kind: input, shape index: {}]   ;;  %s2107_s6 = inlined_call_operand.vmem [shape: f32[8,13], index: 6, kind: input, shape index: {}]  }
   0x1   :  { %v1488_v0 = vld [vmem:[%s2098_s2] sm:$0xff]   ;;  %v1489_v1 = vld [vmem:[%s2098_s2 + $0x8] sm:$0xff]   ;;  %v1492_v4 = vld [vmem:[%s2100_s1 + $0x10] sm:$0xff]   ;;  %s1303_s21 = sadd.s32 4294967295, %s2103_s0 }
   0x2   :  { %1351 = vmatprep.subr.bf16.mxu0 %v1488_v0  ;;  %v1490_v2 = vld [vmem:[%s2100_s1] sm:$0xff]   ;;  %v1491_v3 = vld [vmem:[%s2100_s1 + $0x8] sm:$0xff]   ;;  %v1493_v5 = vld [vmem:[%s2100_s1 + $0x18] sm:$0xff]   ;;  %p1304_p0 = scmp.le.s32.totalorder %s1303_s21, 0 }
   0x3   :  { %1352 = vmatpush3.bf16.msra.mxu0 %v1488_v0  ;;  %1355 = vmatprep.mubr.msk.bf16.mxu0 %vm111_vm0, %v1490_v2  ;;  %v1494_v6 = vld [vmem:[%s2100_s1 + $0x20] sm:$0xff]   ;;  %v1495_v7 = vld [vmem:[%s2100_s1 + $0x28] sm:$0xff]   ;;  %v1496_v8 = vld [vmem:[%s2100_s1 + $0x30] sm:$0xff]   ;;  %s2065_s22 = smov (!%p1304_p0), 0  }
   0x4   :  { %1353 = vmatprep.subr.bf16.mxu0 %v1489_v1  ;;  %v1497_v9 = vld [vmem:[%s2100_s1 + $0x38] sm:$0xff]   ;;  %v426_v10 = vld [vmem:[%s2101_s4] sm:$0xff]  ;;  %v427_v11 = vld [vmem:[%s2101_s4 + $0x8] sm:$0x1f] }
   0x5   :  { %v1427_v12 = vpack.c.bf16 %v427_v11, %v426_v10  ;;  %vm1682_vm3 = vmpackc.low %vm448_vm1, %vm1583_vm2  ;;  %v428_v14 = vld [vmem:[%s2101_s4 + $0x10] sm:$0xff]  ;;  %v429_v15 = vld [vmem:[%s2101_s4 + $0x18] sm:$0x1f] }
   0x6   :  { %v1433_v16 = vpack.c.bf16 %v429_v15, %v428_v14  ;;  %v1701_v17 = vld [vmem:[%s2102_s3] ss:$0 sm:$0xff]  ;;  %v431_v22 = vld [vmem:[%s2101_s4 + $0x28] sm:$0x1f]  ;;  %v432_v31 = vld [vmem:[%s2101_s4 + $0x30] sm:$0xff] }
   0x7   :  { %1354 = vmatpush3.bf16.msra.mxu0 %v1489_v1  ;;  %1429 = vmatprep.subr.msk.bf16.mxu1 %vm1682_vm3, %v1427_v12  ;;  %v430_v21 = vld [vmem:[%s2101_s4 + $0x20] sm:$0xff]  ;;  %v433_v32 = vld [vmem:[%s2101_s4 + $0x38] sm:$0x1f]  ;;  %v435_v39 = vld [vmem:[%s2101_s4 + $0x48] sm:$0x1f] }
   0x8   :  { %1432 = vmatpush3.bf16.msk.msra.mxu1 %vm1682_vm3, %v1427_v12  ;;  %v1439_v29 = vpack.c.bf16 %v431_v22, %v430_v21  ;;  %v1445_v37 = vpack.c.bf16 %v433_v32, %v432_v31  ;;  %v434_v38 = vld [vmem:[%s2101_s4 + $0x40] sm:$0xff]  ;;  %v436_v47 = vld [vmem:[%s2101_s4 + $0x50] sm:$0xff]  ;;  %v437_v48 = vld [vmem:[%s2101_s4 + $0x58] sm:$0x1f] }
   0x9   :  { %1435 = vmatprep.subr.msk.bf16.mxu1 %vm1682_vm3, %v1433_v16  ;;  %v1451_v46 = vpack.c.bf16 %v435_v39, %v434_v38  ;;  %v1457_v54 = vpack.c.bf16 %v437_v48, %v436_v47  ;;  %v438_v55 = vld [vmem:[%s2101_s4 + $0x60] sm:$0xff]  ;;  %v439_v56 = vld [vmem:[%s2101_s4 + $0x68] sm:$0x1f]  ;;  %v440_v0 = vld [vmem:[%s2101_s4 + $0x70] sm:$0xff] }
   0xa   :  { %1356 = vmatmul.mubr.msk.bf16.vlgmr.msra.gmra.mrb[0].mxu0 %vm111_vm0, %v1491_v3  ;;  %v1463_v63 = vpack.c.bf16 %v439_v56, %v438_v55  ;;  %v441_v1 = vld [vmem:[%s2101_s4 + $0x78] sm:$0x1f] }
   0xb   :  { %1359 = vmatprep.mubr.msk.bf16.mxu0 %vm111_vm0, %v1492_v4 }
  0x12   :  { %1360 = vmatmul.mubr.msk.bf16.gmra.mrb[4].mxu0 %vm111_vm0, %v1493_v5 }
  0x13   :  { %1363 = vmatprep.mubr.msk.bf16.mxu0 %vm111_vm0, %v1494_v6  ;;  %v1469_v6 = vpack.c.bf16 %v441_v1, %v440_v0 }
  0x1a   :  { %1364 = vmatmul.mubr.msk.bf16.gmra.mrb[8].mxu0 %vm111_vm0, %v1495_v7 }
  0x1b   :  { %1367 = vmatprep.mubr.msk.bf16.mxu0 %vm111_vm0, %v1496_v8 }
  0x22   :  { %1368 = vmatmul.mubr.msk.bf16.gmra.mrb[12].mxu0 %vm111_vm0, %v1497_v9 }
  0xdd   :  { %v1357_v18 = vpop.f32.mrb[0].mxu0 }
  0xde   :  { %v1704_v19 = vadd.f32 %v1357_v18, %v1701_v17  ;;  %v170_v20 = vpop.f32.mrb[1].mxu0 }
  0xdf   :  { %v1713_v23 = vadd.f32 %v1701_v17, %v170_v20  ;;  %v1358_v24 = vpop.f32.mrb[2].mxu0 }
  0xe0   :  { %v1716_v25 = vadd.f32 %v1358_v24, %v1701_v17  ;;  %v173_v26 = vpop.f32.mrb[3].mxu0  ;;  %v240_v27 = vsel %vm233_vm4, %v1704_v19, -inf }
  0xe1   :  { %v1721_v28 = vadd.f32 %v1701_v17, %v173_v26  ;;  %241 = vmax.xlane.f32.xlu0 %v240_v27  ;;  %1375 = vmatprep.mubr.msk.f32.mxu1 %vm233_vm4, %v1713_v23  ;;  %v234_v33 = vsel %vm233_vm4, %v1713_v23, -inf }
  0xe2   :  { %v243_v30 = vsel %vm233_vm4, %v1716_v25, -inf }
  0xe3   :  { %244 = vmax.xlane.f32.xlu1 %v243_v30  ;;  %1376 = vmatmul.mubr.msk.f32.vlgmr.msra.gmra.mrb[0].mxu1 %vm233_vm4, %v1721_v28  ;;  %v237_v45 = vsel %vm233_vm4, %v1721_v28, -inf }
  0xe4   :  { %1438 = vmatpush3.bf16.msk.msra.mxu1 %vm1682_vm3, %v1433_v16  ;;  %1382 = vmatprep.mubr.msk.f32.mxu1 %vm233_vm4, %v1704_v19 }
  0xe5   :  { %v1361_v34 = vpop.f32.mrb[4].mxu0  ;;  %235 = vmax.xlane.f32.xlu0 %v234_v33  ;;  %1441 = vmatprep.subr.msk.bf16.mxu1 %vm1682_vm3, %v1439_v29 }
  0xe6   :  { %v1744_v35 = vadd.f32 %v1361_v34, %v1701_v17  ;;  %v186_v36 = vpop.f32.mrb[5].mxu0 }
  0xe7   :  { %v1753_v40 = vadd.f32 %v1701_v17, %v186_v36  ;;  %v1362_v41 = vpop.f32.mrb[6].mxu0  ;;  %1383 = vmatmul.mubr.msk.f32.vlgmr.msra.gmra.mrb[2].mxu1 %vm233_vm4, %v1716_v25 }
  0xe8   :  { %v189_v42 = vpop.f32.mrb[7].mxu0  ;;  %1444 = vmatpush3.bf16.msk.msra.mxu1 %vm1682_vm3, %v1439_v29  ;;  %v252_v43 = vsel %vm233_vm4, %v1744_v35, -inf  ;;  %v1785_v50 = vadd.f32 %v1362_v41, %v1701_v17 }
  0xe9   :  { %v1762_v44 = vadd.f32 %v1701_v17, %v189_v42  ;;  %253 = vmax.xlane.f32.xlu1 %v252_v43  ;;  %1389 = vmatprep.mubr.msk.f32.mxu1 %vm233_vm4, %v1753_v40  ;;  %v246_v49 = vsel %vm233_vm4, %v1753_v40, -inf }
  0xea   :  { %238 = vmax.xlane.f32.xlu0 %v237_v45  ;;  %1447 = vmatprep.subr.msk.bf16.mxu1 %vm1682_vm3, %v1445_v37  ;;  %v255_v14 = vsel %vm233_vm4, %v1785_v50, -inf }
  0xeb   :  { %1390 = vmatmul.mubr.msk.f32.vlgmr.msra.gmra.mrb[4].mxu1 %vm233_vm4, %v1762_v44  ;;  %v249_v16 = vsel %vm233_vm4, %v1762_v44, -inf }
  0xec   :  { %1450 = vmatpush3.bf16.msk.msra.mxu1 %vm1682_vm3, %v1445_v37  ;;  %1396 = vmatprep.mubr.msk.f32.mxu1 %vm233_vm4, %v1744_v35 }
  0xed   :  { %v1365_v51 = vpop.f32.mrb[8].mxu0  ;;  %247 = vmax.xlane.f32.xlu1 %v246_v49  ;;  %1453 = vmatprep.subr.msk.bf16.mxu1 %vm1682_vm3, %v1451_v46 }
  0xee   :  { %v1790_v52 = vadd.f32 %v1365_v51, %v1701_v17  ;;  %v202_v53 = vpop.f32.mrb[9].mxu0 }
  0xef   :  { %v1799_v57 = vadd.f32 %v1701_v17, %v202_v53  ;;  %v1366_v58 = vpop.f32.mrb[10].mxu0  ;;  %1397 = vmatmul.mubr.msk.f32.vlgmr.msra.gmra.mrb[6].mxu1 %vm233_vm4, %v1785_v50 }
  0xf0   :  { %v205_v59 = vpop.f32.mrb[11].mxu0  ;;  %1456 = vmatpush3.bf16.msk.msra.mxu1 %vm1682_vm3, %v1451_v46  ;;  %v264_v60 = vsel %vm233_vm4, %v1790_v52, -inf  ;;  %v1829_v2 = vadd.f32 %v1366_v58, %v1701_v17 }
  0xf1   :  { %v1808_v61 = vadd.f32 %v1701_v17, %v205_v59  ;;  %265 = vmax.xlane.f32.xlu1 %v264_v60  ;;  %1403 = vmatprep.mubr.msk.f32.mxu1 %vm233_vm4, %v1799_v57  ;;  %v258_v62 = vsel %vm233_vm4, %v1799_v57, -inf }
  0xf2   :  { %259 = vmax.xlane.f32.xlu0 %v258_v62  ;;  %1459 = vmatprep.subr.msk.bf16.mxu1 %vm1682_vm3, %v1457_v54  ;;  %v267_v13 = vsel %vm233_vm4, %v1829_v2, -inf }
  0xf3   :  { %1404 = vmatmul.mubr.msk.f32.vlgmr.msra.gmra.mrb[8].mxu1 %vm233_vm4, %v1808_v61  ;;  %v261_v18 = vsel %vm233_vm4, %v1808_v61, -inf }
  0xf4   :  { %1462 = vmatpush3.bf16.msk.msra.mxu1 %vm1682_vm3, %v1457_v54  ;;  %1410 = vmatprep.mubr.msk.f32.mxu1 %vm233_vm4, %v1790_v52 }
  0xf5   :  { %v1369_v3 = vpop.f32.mrb[12].mxu0  ;;  %1465 = vmatprep.subr.msk.bf16.mxu1 %vm1682_vm3, %v1463_v63 }
  0xf6   :  { %v1834_v4 = vadd.f32 %v1369_v3, %v1701_v17  ;;  %v218_v5 = vpop.f32.mrb[13].mxu0 }
  0xf7   :  { %v1837_v7 = vadd.f32 %v1701_v17, %v218_v5  ;;  %v1370_v8 = vpop.f32.mrb[14].mxu0  ;;  %1411 = vmatmul.mubr.msk.f32.vlgmr.msra.gmra.mrb[10].mxu1 %vm233_vm4, %v1829_v2 }
  0xf8   :  { %v221_v9 = vpop.f32.mrb[15].mxu0  ;;  %1468 = vmatpush3.bf16.msk.msra.mxu1 %vm1682_vm3, %v1463_v63  ;;  %v276_v10 = vsel %vm233_vm4, %v1834_v4, -inf  ;;  %v1863_v15 = vadd.f32 %v1370_v8, %v1701_v17 }
  0xf9   :  { %v1846_v11 = vadd.f32 %v1701_v17, %v221_v9  ;;  %277 = vmax.xlane.f32.xlu1 %v276_v10  ;;  %1417 = vmatprep.mubr.msk.f32.mxu1 %vm233_vm4, %v1837_v7  ;;  %v270_v12 = vsel %vm233_vm4, %v1837_v7, -inf }
  0xfa   :  { %271 = vmax.xlane.f32.xlu0 %v270_v12  ;;  %1471 = vmatprep.subr.msk.bf16.mxu1 %vm1682_vm3, %v1469_v6  ;;  %v279_v17 = vsel %vm233_vm4, %v1863_v15, -inf }
  0xfb   :  { %1418 = vmatmul.mubr.msk.f32.vlgmr.msra.gmra.mrb[12].mxu1 %vm233_vm4, %v1846_v11  ;;  %v273_v20 = vsel %vm233_vm4, %v1846_v11, -inf }
  0xfc   :  { %1474 = vmatpush3.bf16.msk.msra.mxu1 %vm1682_vm3, %v1469_v6  ;;  %1424 = vmatprep.mubr.msk.f32.mxu1 %vm233_vm4, %v1834_v4 }
  0xfd   :  { %256 = vmax.xlane.f32.xlu1 %v255_v14 }
  0xfe   :  { %250 = vmax.xlane.f32.xlu0 %v249_v16 }
  0xff   :  { %1425 = vmatmul.mubr.msk.f32.vlgmr.msra.gmra.mrb[14].mxu1 %vm233_vm4, %v1863_v15 }
 0x101   :  { %268 = vmax.xlane.f32.xlu1 %v267_v13 }
 0x102   :  { %262 = vmax.xlane.f32.xlu0 %v261_v18 }
 0x105   :  { %280 = vmax.xlane.f32.xlu1 %v279_v17 }
 0x106   :  { %274 = vmax.xlane.f32.xlu0 %v273_v20 }
 0x16e   :  { %v1877_v21 = vpop.xlane.xlu0 %241 }
 0x16f   :  { %v284_v22 = vsub.f32 %v1704_v19, %v1877_v21 }
 0x170   :  { %v1881_v24 = vpop.xlane.xlu1 %244 }
 0x171   :  { %v302_v26 = vmul.f32 1.442695, %v284_v22  ;;  %v285_v27 = vsub.f32 %v1716_v25, %v1881_v24 }
 0x172   :  { %v1885_v29 = vpop.xlane.xlu0 %235 }
 0x173   :  { %1498 = vpow2.f32 %v302_v26  ;;  %v304_v30 = vmul.f32 1.442695, %v285_v27  ;;  %v282_v31 = vsub.f32 %v1713_v23, %v1885_v29 }
 0x175   :  { %1500 = vpow2.f32 %v304_v30  ;;  %v298_v32 = vmul.f32 1.442695, %v282_v31 }
 0x176   :  { %v1889_v33 = vpop.xlane.xlu1 %253 }
 0x177   :  { %1502 = vpow2.f32 %v298_v32  ;;  %v288_v19 = vsub.f32 %v1744_v35, %v1889_v33  ;;  %v1893_v34 = vpop.xlane.xlu0 %238 }
 0x178   :  { %v283_v25 = vsub.f32 %v1721_v28, %v1893_v34 }
 0x179   :  { %v310_v36 = vmul.f32 1.442695, %v288_v19 }
 0x17a   :  { %v300_v37 = vmul.f32 1.442695, %v283_v25  ;;  %v1897_v38 = vpop.xlane.xlu1 %247 }
 0x17b   :  { %1504 = vpow2.f32 %v310_v36  ;;  %v286_v23 = vsub.f32 %v1753_v40, %v1897_v38 }
 0x17c   :  { %1506 = vpow2.f32 %v300_v37 }
 0x17d   :  { %v1499_v39 = vpop.eup %1498  ;;  %v306_v41 = vmul.f32 1.442695, %v286_v23 }
 0x17e   :  { %v1901_v42 = vpop.xlane.xlu1 %265  ;;  %v336_v35 = vsel %vm233_vm4, %v1499_v39, 0.0 }
 0x17f   :  { %v1501_v43 = vpop.eup %1500  ;;  %1508 = vpow2.f32 %v306_v41  ;;  %v292_v28 = vsub.f32 %v1790_v52, %v1901_v42  ;;  %337 = vadd.xlane.f32.xlu1 %v336_v35  ;;  %v1906_v45 = vpop.xlane.xlu0 %259 }
 0x180   :  { %v290_v46 = vsub.f32 %v1799_v57, %v1906_v45  ;;  %v339_v49 = vsel %vm233_vm4, %v1501_v43, 0.0 }
 0x181   :  { %v1503_v47 = vpop.eup %1502  ;;  %v318_v40 = vmul.f32 1.442695, %v292_v28 }
 0x182   :  { %v314_v48 = vmul.f32 1.442695, %v290_v46  ;;  %v330_v51 = vsel %vm233_vm4, %v1503_v47, 0.0 }
 0x183   :  { %1510 = vpow2.f32 %v318_v40  ;;  %340 = vadd.xlane.f32.xlu1 %v339_v49  ;;  %331 = vadd.xlane.f32.xlu0 %v330_v51  ;;  %v1147_v40 = vlaneseq }
 0x184   :  { %1512 = vpow2.f32 %v314_v48 }
 0x185   :  { %v1505_v53 = vpop.eup %1504  ;;  %v1961_v48 = vand.u32 127, %v1147_v40 }
 0x186   :  { %v1507_v54 = vpop.eup %1506  ;;  %v1912_v52 = vpop.xlane.xlu1 %277  ;;  %v348_v55 = vsel %vm233_vm4, %v1505_v53, 0.0 }
 0x187   :  { %v296_v56 = vsub.f32 %v1834_v4, %v1912_v52  ;;  %349 = vadd.xlane.f32.xlu1 %v348_v55  ;;  %v333_v57 = vsel %vm233_vm4, %v1507_v54, 0.0  ;;  %v1918_v58 = vpop.xlane.xlu0 %271  ;;  %vm1149_vm5 = vcmp.ge.s32.totalorder %v1961_v48, 1  ;;  %vm1157_vm9 = vcmp.le.s32.totalorder %v1961_v48, 1 }
 0x188   :  { %334 = vadd.xlane.f32.xlu0 %v333_v57  ;;  %v294_v59 = vsub.f32 %v1837_v7, %v1918_v58  ;;  %v1973_v57 = vld [vmem:[%s2104_s5] sm:$0xff] }
 0x189   :  { %v1509_v60 = vpop.eup %1508  ;;  %v326_v62 = vmul.f32 1.442695, %v296_v56  ;;  %vm1151_vm6 = vcmp.gt.f32.partialorder %v1973_v57, 0.5 }
 0x18a   :  { %v322_v63 = vmul.f32 1.442695, %v294_v59  ;;  %v1922_v0 = vpop.xlane.xlu1 %256  ;;  %v342_v1 = vsel %vm233_vm4, %v1509_v60, 0.0  ;;  %v1978_v59 = vld [vmem:[%s2105_s7] sm:$0xff] }
 0x18b   :  { %1514 = vpow2.f32 %v326_v62  ;;  %v289_v3 = vsub.f32 %v1785_v50, %v1922_v0  ;;  %v1927_v4 = vpop.xlane.xlu0 %250  ;;  %v1983_v60 = vld [vmem:[%s2106_s8] sm:$0xff]  ;;  %vm1155_vm7 = vcmp.gt.f32.partialorder %v1978_v59, 0.5 }
 0x18c   :  { %1516 = vpow2.f32 %v322_v63  ;;  %343 = vadd.xlane.f32.xlu0 %v342_v1  ;;  %v287_v5 = vsub.f32 %v1762_v44, %v1927_v4 }
 0x18d   :  { %v1511_v6 = vpop.eup %1510  ;;  %v312_v7 = vmul.f32 1.442695, %v289_v3 }
 0x18e   :  { %v1513_v8 = vpop.eup %1512  ;;  %v308_v9 = vmul.f32 1.442695, %v287_v5  ;;  %v1931_v10 = vpop.xlane.xlu1 %268  ;;  %v360_v12 = vsel %vm233_vm4, %v1511_v6, 0.0 }
 0x18f   :  { %1518 = vpow2.f32 %v312_v7  ;;  %v293_v14 = vsub.f32 %v1829_v2, %v1931_v10  ;;  %361 = vadd.xlane.f32.xlu1 %v360_v12  ;;  %v1936_v50 = vpop.xlane.xlu0 %262  ;;  %v354_v16 = vsel %vm233_vm4, %v1513_v8, 0.0 }
 0x190   :  { %1520 = vpow2.f32 %v308_v9  ;;  %v291_v44 = vsub.f32 %v1808_v61, %v1936_v50  ;;  %355 = vadd.xlane.f32.xlu0 %v354_v16 }
 0x191   :  { %v320_v13 = vmul.f32 1.442695, %v293_v14 }
 0x192   :  { %v316_v18 = vmul.f32 1.442695, %v291_v44  ;;  %v1941_v17 = vpop.xlane.xlu1 %280 }
 0x193   :  { %1522 = vpow2.f32 %v320_v13  ;;  %v297_v20 = vsub.f32 %v1863_v15, %v1941_v17  ;;  %v1945_v22 = vpop.xlane.xlu0 %274 }
 0x194   :  { %1524 = vpow2.f32 %v316_v18  ;;  %v295_v2 = vsub.f32 %v1846_v11, %v1945_v22 }
 0x195   :  { %v1515_v26 = vpop.eup %1514  ;;  %v328_v27 = vmul.f32 1.442695, %v297_v20 }
 0x196   :  { %v1517_v30 = vpop.eup %1516  ;;  %v324_v31 = vmul.f32 1.442695, %v295_v2  ;;  %v372_v61 = vsel %vm233_vm4, %v1515_v26, 0.0 }
 0x197   :  { %1526 = vpow2.f32 %v328_v27  ;;  %373 = vadd.xlane.f32.xlu1 %v372_v61  ;;  %v366_v32 = vsel %vm233_vm4, %v1517_v30, 0.0 }
 0x198   :  { %1528 = vpow2.f32 %v324_v31  ;;  %367 = vadd.xlane.f32.xlu0 %v366_v32 }
 0x199   :  { %v1519_v19 = vpop.eup %1518 }
 0x19a   :  { %v1521_v15 = vpop.eup %1520  ;;  %v351_v25 = vsel %vm233_vm4, %v1519_v19, 0.0 }
 0x19b   :  { %352 = vadd.xlane.f32.xlu1 %v351_v25  ;;  %v345_v36 = vsel %vm233_vm4, %v1521_v15, 0.0 }
 0x19c   :  { %346 = vadd.xlane.f32.xlu0 %v345_v36 }
 0x19d   :  { %v1523_v11 = vpop.eup %1522 }
 0x19e   :  { %v1525_v37 = vpop.eup %1524  ;;  %v363_v23 = vsel %vm233_vm4, %v1523_v11, 0.0 }
 0x19f   :  { %364 = vadd.xlane.f32.xlu1 %v363_v23  ;;  %v357_v39 = vsel %vm233_vm4, %v1525_v37, 0.0 }
 0x1a0   :  { %358 = vadd.xlane.f32.xlu0 %v357_v39 }
 0x1a1   :  { %v1527_v41 = vpop.eup %1526 }
 0x1a2   :  { %v1529_v35 = vpop.eup %1528  ;;  %v375_v43 = vsel %vm233_vm4, %v1527_v41, 0.0 }
 0x1a3   :  { %376 = vadd.xlane.f32.xlu1 %v375_v43  ;;  %v369_v28 = vsel %vm233_vm4, %v1529_v35, 0.0 }
 0x1a4   :  { %370 = vadd.xlane.f32.xlu0 %v369_v28 }
 0x1b6   :  { %v1957_v46 = vpop.f32.mrb[0].mxu1 }
 0x1b7   :  { %v1959_v47 = vpop.f32.mrb[1].mxu1 }
 0x1ba   :  { %v1384_v49 = vpop.f32.mrb[2].mxu1 }
 0x1bb   :  { %v602_v51 = vpop.f32.mrb[3].mxu1 }
 0x1be   :  { %v1964_v53 = vpop.f32.mrb[4].mxu1 }
 0x1bf   :  { %v1966_v54 = vpop.f32.mrb[5].mxu1 }
 0x1c2   :  { %v1968_v55 = vpop.f32.mrb[6].mxu1 }
 0x1c3   :  { %v770_v56 = vpop.f32.mrb[7].mxu1 }
 0x1c6   :  { %v1990_v62 = vpop.f32.mrb[8].mxu1 }
 0x1c7   :  { %v1992_v63 = vpop.f32.mrb[9].mxu1 }
 0x1ca   :  { %v1994_v1 = vpop.f32.mrb[10].mxu1 }
 0x1cb   :  { %v1996_v3 = vpop.f32.mrb[11].mxu1 }
 0x1ce   :  { %v1998_v5 = vpop.f32.mrb[12].mxu1 }
 0x1cf   :  { %v2000_v6 = vpop.f32.mrb[13].mxu1 }
 0x1d2   :  { %v2002_v7 = vpop.f32.mrb[14].mxu1 }
 0x1d3   :  { %v2004_v8 = vpop.f32.mrb[15].mxu1 }
 0x20c   :  { %v338_v9 = vpop.xlane.xlu1 %337 }
 0x20d   :  { %1530 = vlog2.f32 %v338_v9 }
 0x210   :  { %v341_v12 = vpop.xlane.xlu1 %340  ;;  %v332_v14 = vpop.xlane.xlu0 %331 }
 0x211   :  { %1532 = vlog2.f32 %v341_v12 }
 0x212   :  { %1534 = vlog2.f32 %v332_v14 }
 0x214   :  { %v350_v16 = vpop.xlane.xlu1 %349 }
 0x215   :  { %1536 = vlog2.f32 %v350_v16  ;;  %v335_v44 = vpop.xlane.xlu0 %334 }
 0x216   :  { %1538 = vlog2.f32 %v335_v44 }
 0x217   :  { %v1531_v13 = vpop.eup %1530 }
 0x218   :  { %v383_v18 = vmul.f32 0.6931472, %v1531_v13 }
 0x219   :  { %v344_v20 = vpop.xlane.xlu0 %343 }
 0x21a   :  { %v412_v2 = vadd.f32 %v383_v18, %v1877_v21  ;;  %1540 = vlog2.f32 %v344_v20 }
 0x21b   :  { %v1533_v26 = vpop.eup %1532 }
 0x21c   :  { %v1535_v27 = vpop.eup %1534  ;;  %v1117_v30 = vsub.f32 %v602_v51, %v412_v2  ;;  %v385_v31 = vmul.f32 0.6931472, %v1533_v26  ;;  %v362_v61 = vpop.xlane.xlu1 %361 }
 0x21d   :  { %v379_v32 = vmul.f32 0.6931472, %v1535_v27  ;;  %1542 = vlog2.f32 %v362_v61  ;;  %v356_v19 = vpop.xlane.xlu0 %355 }
 0x21e   :  { %1133 = vst.msk [vmem:[#allocation2 + $0x10] sm:$0xff] %vm233_vm4, %v1117_v30  ;;  %v413_v15 = vadd.f32 %v385_v31, %v1881_v24  ;;  %1544 = vlog2.f32 %v356_v19 }
 0x21f   :  { %v1537_v25 = vpop.eup %1536  ;;  %v410_v36 = vadd.f32 %v379_v32, %v1885_v29 }
 0x220   :  { %v1539_v11 = vpop.eup %1538  ;;  %v1118_v37 = vsub.f32 %v1384_v49, %v413_v15  ;;  %v391_v21 = vmul.f32 0.6931472, %v1537_v25 }
 0x221   :  { %v1115_v23 = vsub.f32 %v1959_v47, %v410_v36  ;;  %v381_v39 = vmul.f32 0.6931472, %v1539_v11 }
 0x222   :  { %1134 = vst.msk [vmem:[#allocation2 + $0x18] sm:$0xff] %vm233_vm4, %v1118_v37  ;;  %v416_v41 = vadd.f32 %v391_v21, %v1889_v33 }
 0x223   :  { %1131 = vst.msk [vmem:[#allocation2] sm:$0xff] %vm233_vm4, %v1115_v23  ;;  %v411_v35 = vadd.f32 %v381_v39, %v1893_v34 }
 0x224   :  { %v1541_v43 = vpop.eup %1540  ;;  %v1121_v24 = vsub.f32 %v770_v56, %v416_v41  ;;  %v374_v28 = vpop.xlane.xlu1 %373 }
 0x225   :  { %v1116_v40 = vsub.f32 %v1957_v46, %v411_v35  ;;  %v387_v29 = vmul.f32 0.6931472, %v1541_v43  ;;  %1546 = vlog2.f32 %v374_v28  ;;  %v368_v49 = vpop.xlane.xlu0 %367 }
 0x226   :  { %1137 = vst.msk [vmem:[#allocation2 + $0x30] sm:$0xff] %vm233_vm4, %v1121_v24  ;;  %1548 = vlog2.f32 %v368_v49 }
 0x227   :  { %v1543_v47 = vpop.eup %1542  ;;  %1132 = vst.msk [vmem:[#allocation2 + $0x8] sm:$0xff] %vm233_vm4, %v1116_v40  ;;  %v414_v33 = vadd.f32 %v387_v29, %v1897_v38 }
 0x228   :  { %v1545_v51 = vpop.eup %1544  ;;  %v399_v9 = vmul.f32 0.6931472, %v1543_v47  ;;  %v353_v12 = vpop.xlane.xlu1 %352 }
 0x229   :  { %v1119_v34 = vsub.f32 %v1966_v54, %v414_v33  ;;  %v395_v56 = vmul.f32 0.6931472, %v1545_v51  ;;  %1550 = vlog2.f32 %v353_v12  ;;  %v347_v14 = vpop.xlane.xlu0 %346 }
 0x22a   :  { %v420_v46 = vadd.f32 %v399_v9, %v1901_v42  ;;  %1552 = vlog2.f32 %v347_v14  ;;  %v1161_v23 = vld [vmem:[#allocation2] ss:$16 sm:$0x3] }
 0x22b   :  { %1135 = vst.msk [vmem:[#allocation2 + $0x20] sm:$0xff] %vm233_vm4, %v1119_v34  ;;  %v418_v16 = vadd.f32 %v395_v56, %v1906_v45 }
 0x22c   :  { %v1125_v44 = vsub.f32 %v1996_v3, %v420_v46  ;;  %v365_v13 = vpop.xlane.xlu1 %364 }
 0x22d   :  { %v1123_v38 = vsub.f32 %v1992_v63, %v418_v16  ;;  %1554 = vlog2.f32 %v365_v13  ;;  %v359_v18 = vpop.xlane.xlu0 %358 }
 0x22e   :  { %1141 = vst.msk [vmem:[#allocation2 + $0x50] sm:$0xff] %vm233_vm4, %v1125_v44  ;;  %1556 = vlog2.f32 %v359_v18 }
 0x22f   :  { %v1547_v54 = vpop.eup %1546  ;;  %1139 = vst.msk [vmem:[#allocation2 + $0x40] sm:$0xff] %vm233_vm4, %v1123_v38 }
 0x230   :  { %v1549_v20 = vpop.eup %1548  ;;  %v407_v42 = vmul.f32 0.6931472, %v1547_v54  ;;  %v377_v2 = vpop.xlane.xlu1 %376 }
 0x231   :  { %v403_v26 = vmul.f32 0.6931472, %v1549_v20  ;;  %1558 = vlog2.f32 %v377_v2  ;;  %v371_v27 = vpop.xlane.xlu0 %370 }
 0x232   :  { %v424_v45 = vadd.f32 %v407_v42, %v1912_v52  ;;  %1560 = vlog2.f32 %v371_v27  ;;  %v1162_v11 = vld [vmem:[#allocation2] ss:$16 sm:$0xc] }
 0x233   :  { %v1551_v3 = vpop.eup %1550  ;;  %v422_v63 = vadd.f32 %v403_v26, %v1918_v58  ;;  %v2038_v58 = vld [vmem:[%s2107_s6] sm:$0xff]  ;;  %v1163_v41 = vor.u32 %v1162_v11, %v1161_v23 }
 0x234   :  { %v1553_v30 = vpop.eup %1552  ;;  %v1129_v31 = vsub.f32 %v2004_v8, %v424_v45  ;;  %v393_v61 = vmul.f32 0.6931472, %v1551_v3  ;;  %vm1153_vm8 = vcmp.gt.f32.partialorder %v2038_v58, 0.5 }
 0x235   :  { %v1127_v32 = vsub.f32 %v2000_v6, %v422_v63  ;;  %v389_v19 = vmul.f32 0.6931472, %v1553_v30  ;;  %vm1160_vm10 = vmand %vm1157_vm9, %vm1153_vm8 }
 0x236   :  { %1145 = vst.msk [vmem:[#allocation2 + $0x70] sm:$0xff] %vm233_vm4, %v1129_v31  ;;  %v417_v15 = vadd.f32 %v393_v61, %v1922_v0  ;;  %v1164_v0 = vld [vmem:[#allocation2] ss:$16 sm:$0x30] }
 0x237   :  { %v1555_v25 = vpop.eup %1554  ;;  %1143 = vst.msk [vmem:[#allocation2 + $0x60] sm:$0xff] %vm233_vm4, %v1127_v32  ;;  %v415_v52 = vadd.f32 %v389_v19, %v1927_v4  ;;  %v1165_v24 = vor.u32 %v1164_v0, %v1163_v41 }
 0x238   :  { %v1557_v36 = vpop.eup %1556  ;;  %v1122_v8 = vsub.f32 %v1968_v55, %v417_v15  ;;  %v401_v6 = vmul.f32 0.6931472, %v1555_v25 }
 0x239   :  { %v1120_v37 = vsub.f32 %v1964_v53, %v415_v52  ;;  %v397_v21 = vmul.f32 0.6931472, %v1557_v36 }
 0x23a   :  { %1138 = vst.msk [vmem:[#allocation2 + $0x38] sm:$0xff] %vm233_vm4, %v1122_v8  ;;  %v421_v39 = vadd.f32 %v401_v6, %v1931_v10 }
 0x23b   :  { %v1559_v4 = vpop.eup %1558  ;;  %1136 = vst.msk [vmem:[#allocation2 + $0x28] sm:$0xff] %vm233_vm4, %v1120_v37  ;;  %v419_v55 = vadd.f32 %v397_v21, %v1936_v50 }
 0x23c   :  { %v1561_v35 = vpop.eup %1560  ;;  %v1126_v53 = vsub.f32 %v1994_v1, %v421_v39  ;;  %v409_v43 = vmul.f32 0.6931472, %v1559_v4 }
 0x23d   :  { %v1124_v28 = vsub.f32 %v1990_v62, %v419_v55  ;;  %v405_v40 = vmul.f32 0.6931472, %v1561_v35  ;;  %1257 = sbr.rel (%p1304_p0) target bundleno = 982 (0x3d6), region = 54 }
 0x23e   :  { %v1166_v10 = vld [vmem:[#allocation2] ss:$16 sm:$0xc0]  ;;  %1142 = vst.msk [vmem:[#allocation2 + $0x58] sm:$0xff] %vm233_vm4, %v1126_v53  ;;  %v425_v29 = vadd.f32 %v409_v43, %v1941_v17 }
 0x23f   :  { %v1167_v49 = vor.u32 %v1166_v10, %v1165_v24  ;;  %1140 = vst.msk [vmem:[#allocation2 + $0x48] sm:$0xff] %vm233_vm4, %v1124_v28  ;;  %v423_v50 = vadd.f32 %v405_v40, %v1945_v22 }
 0x240   :  { %v1130_v1 = vsub.f32 %v2002_v7, %v425_v29 }
 0x241   :  { %v1168_v47 = vsel %vm1160_vm10, %v1167_v49, -1e+30  ;;  %v1128_v33 = vsub.f32 %v1998_v5, %v423_v50 }
 0x242   :  { %1169 = vst.msk [vmem:[#allocation3] sm:$0xff] %vm233_vm4, %v1168_v47  ;;  %1146 = vst.msk [vmem:[#allocation2 + $0x78] sm:$0xff] %vm233_vm4, %v1130_v1 }
 0x243   :  { %1144 = vst.msk [vmem:[#allocation2 + $0x68] sm:$0xff] %vm233_vm4, %v1128_v33 }
 0x244 LB: > { %s1584_s23 = smov 13   ;;  %v1585_v22 = vmov 0   ;;  %s2071_s24 = sadd.s32 1, %s1581_s22   ;;  %vm1180_vm11 = vcmask 1047656   ;;  %s1581_s22 = sphi %s2065_s22, %s2110_s22  }
 0x245   : > { %1562 = vset.pattern.permute.xlu0 %v1585_v22  ;;  %v1224_v62 = vstv %s2071_s24  ;;  %s1586_s25 = smov 116   ;;  %s1587_s26 = smov 117  }
 0x246   : > { %vm1225_vm12 = vcmp.lt.s32.totalorder %v1224_v62, %v1983_v60  ;;  %s1253_s27 = scalar_lea.vmem [#allocation2], %s1581_s22  ;;  %p1174_p1 = scmp.ge.s32.totalorder %s2071_s24, %s1303_s21 }
 0x247   : > { %v1226_v51 = vsel %vm1225_vm12, 1, %v1585_v22  ;;  %s2110_s22 = smov %s2071_s24 }
 0x249   : > { %v1179_v17 = vld [vmem:[#allocation3] sm:$0xff] }
 0x24a   : > { %1181 = vrot.lane.b32.xlu0 %v1179_v17, %s1584_s23  ;;  %v1305_v63 = vld [vmem:[%s1253_s27 + $0x1] ss:$16 sm:$0x3] }
 0x24b   : > { %v1306_v30 = vld [vmem:[%s1253_s27 + $0x1] ss:$16 sm:$0xc] }
 0x24c   : > { %v1217_v31 = vor.u32 %v1306_v30, %v1305_v63  ;;  %v1307_v61 = vld [vmem:[%s1253_s27 + $0x1] ss:$16 sm:$0x30] }
 0x24d   : > { %v1308_v19 = vld [vmem:[%s1253_s27 + $0x1] ss:$16 sm:$0xc0] }
 0x24e   : > { %v1219_v32 = vor.u32 %v1307_v61, %v1217_v31 }
 0x250   : > { %v1221_v52 = vor.u32 %v1308_v19, %v1219_v32 }
 0x2bc   : > { %v1182_v5 = vpop.permute.xlu0 %1181 }
 0x2bd   : > { %v1183_v7 = vsel %vm1180_vm11, %v1182_v5, %v1179_v17 }
 0x2be   : > { %1184 = vrot.lane.b32.xlu0 %v1183_v7, %s1584_s23 }
 0x2c2   : > { %1228 = vperm.xlu0 %1562, %v1226_v51  }
 0x330   : > { %v1185_v9 = vpop.permute.xlu0 %1184 }
 0x331   : > { %v1186_v12 = vsel %vm1180_vm11, %v1185_v9, %v1179_v17 }
 0x332   : > { %1190 = vrot.lane.b32.xlu1 %v1186_v12, %s1586_s25 }
 0x336   : > { %1194 = vrot.lane.b32.xlu1 %v1186_v12, %s1587_s26 }
 0x341   : > { %v1229_v36 = vpop.permute.xlu0 %1228 }
 0x342   : > { %vm1230_vm13 = vcmp.eq.s32.totalorder %v1229_v36, 1 }
 0x3a4   : > { %v1191_v34 = vpop.permute.xlu1 %1190 }
 0x3a5   : > { %v1193_v14 = vsel %vm1149_vm5, %v1191_v34, -1e+30 }
 0x3a8   : > { %v1195_v56 = vpop.permute.xlu1 %1194 }
 0x3a9   : > { %v1197_v46 = vsel %vm1151_vm6, %v1195_v56, -1e+30 }
 0x3aa   : > { %v1198_v16 = vmax.f32 %v1193_v14, %v1197_v46 }
 0x3ac   : > { %v1199_v44 = vmax.f32 %v1179_v17, %v1198_v16 }
 0x3ae   : > { %v1200_v13 = vsub.f32 %v1179_v17, %v1199_v44  ;;  %v1203_v38 = vsub.f32 %v1193_v14, %v1199_v44  ;;  %v1207_v18 = vsub.f32 %v1197_v46, %v1199_v44 }
 0x3b0   : > { %v1201_v54 = vmul.f32 1.442695, %v1200_v13  ;;  %v1204_v20 = vmul.f32 1.442695, %v1203_v38  ;;  %v1208_v42 = vmul.f32 1.442695, %v1207_v18 }
 0x3b2   : > { %1563 = vpow2.f32 %v1201_v54 }
 0x3b3   : > { %1565 = vpow2.f32 %v1204_v20 }
 0x3b4   : > { %1567 = vpow2.f32 %v1208_v42 }
 0x3bc   : > { %v1564_v2 = vpop.eup %1563 }
 0x3bd   : > { %v1566_v26 = vpop.eup %1565 }
 0x3be   : > { %v1206_v27 = vadd.f32 %v1566_v26, %v1564_v2  ;;  %v1568_v45 = vpop.eup %1567 }
 0x3c0   : > { %v1210_v3 = vadd.f32 %v1568_v45, %v1206_v27 }
 0x3c2   : > { %1569 = vlog2.f32 %v1210_v3 }
 0x3cc   : > { %v1570_v15 = vpop.eup %1569 }
 0x3cd   : > { %v1212_v25 = vmul.f32 0.6931472, %v1570_v15 }
 0x3cf   : > { %v1213_v11 = vadd.f32 %v1212_v25, %v1199_v44  ;;  %1177 = sbr.rel (!%p1174_p1) target bundleno = 580 (0x244), region = 60 }
 0x3d1   : > { %v1222_v8 = vadd.f32 %v1221_v52, %v1213_v11 }
 0x3d3   : > { %v1223_v6 = vsel %vm1153_vm8, %v1222_v8, -1e+30 }
 0x3d4   : > { %v1231_v37 = vsel %vm1230_vm13, %v1223_v6, %v1179_v17 }
 0x3d5   : > { %1232 = vst.msk [vmem:[#allocation3] sm:$0xff] %vm233_vm4, %v1231_v37 }
 0x3d6 PF:  {}
 0x3dc   :  { %v1233_v21 = vld [vmem:[#allocation3] sm:$0xff] }
 0x3dd   :  { %v1234_v23 = vsel %vm1155_vm7, %v1233_v21, -1e+30 }
 0x3de   :  { %v1235_v0 = vsel %vm233_vm4, %v1234_v23, -inf }
 0x3df   :  { %1236 = vmax.xlane.f32.xlu0 %v1235_v0 }
 0x46c   :  { %v1237_v39 = vpop.xlane.xlu0 %1236 }
 0x46d   :  { %v1238_v4 = vsub.f32 %v1234_v23, %v1237_v39 }
 0x46f   :  { %v1239_v41 = vmul.f32 1.442695, %v1238_v4 }
 0x471   :  { %1571 = vpow2.f32 %v1239_v41 }
 0x47b   :  { %v1572_v55 = vpop.eup %1571 }
 0x47c   :  { %v1241_v35 = vsel %vm233_vm4, %v1572_v55, 0.0 }
 0x47d   :  { %1242 = vadd.xlane.f32.xlu0 %v1241_v35 }
 0x50a   :  { %v1243_v53 = vpop.xlane.xlu0 %1242 }
 0x50b   :  { %1573 = vlog2.f32 %v1243_v53 }
 0x515   :  { %v1574_v43 = vpop.eup %1573 }
 0x516   :  { %v1245_v24 = vmul.f32 0.6931472, %v1574_v43 }
 0x518   :  { %v1246_v48 = vadd.f32 %v1245_v24, %v1237_v39 }
 0x51a   :  { %v1247_v57 = vsub.f32 0.0, %v1246_v48 }
 0x51c   :  { %1248 = vst [vmem:[%s2099_s9] sm:$0xff] %v1247_v57 }

</bundles_post_ra>
